<compile_context>
chip_gen: v6e
topology: v6e:2x2x1
jax: 0.10.0
libtpu: 0.0.40
codegen_flags: <defaults>
</compile_context>

<pallas_src>
import jax
import jax.numpy as jnp
from jax.experimental import pallas as pl
from jax.experimental.pallas import tpu as pltpu

# ----- config (CNN mode of RelationPrediction) -----
WORDS_NUM = 100          # config.words_num
WORDS_DIM = 32           # config.words_dim (embedding dim = conv kernel width)
OUTPUT_CHANNEL = 16      # config.output_channel
REL_LABEL = 8            # config.rel_label (target size)
SEQ_LEN = 8
BATCH = 2
PAD = 3                  # max zero-padding needed (conv3 has padding=(3, 0))

KMAX = 4                             # largest conv kernel height
L_MAX = SEQ_LEN + 3                  # conv3 output length (longest of the three)
L_PAD = 16                           # L_MAX rounded up to a sublane multiple (8)
FUSED_K = KMAX * WORDS_DIM           # 128 — contraction width of the fused matmul
FUSED_C = 3 * OUTPUT_CHANNEL         # 48  — [conv1 | conv2 | conv3] channels


# ------------------------- Pallas kernel -------------------------
def rp_cnn_fused_kernel(x_ref, w_ref, bm_ref, wf_ref, bf_ref, out_ref):
    # One MXU pass: (B*L_PAD, 128) @ (128, 3C)  — contraction is exactly 128 wide.
    y = jnp.dot(x_ref[...], w_ref[...], preferred_element_type=jnp.float32)

    # Bias + (-1e9) validity mask folded into a single additive operand.
    # ReLU clamps invalid / padded timesteps to 0, which never wins the max-pool.
    act = jnp.maximum(y + bm_ref[...], 0.0)                      # (B*L_PAD, 3C)

    # Per-batch max-pool over time; slices are sublane-aligned (L_PAD = 16).
    pooled = jnp.concatenate(
        [jnp.max(act[b * L_PAD:(b + 1) * L_PAD, :], axis=0, keepdims=True)
         for b in range(BATCH)],
        axis=0)                                                  # (B, 3C)

    # dropout is identity at inference time; fc1 + log_softmax.
    logits = jnp.dot(pooled, wf_ref[...],
                     preferred_element_type=jnp.float32) + bf_ref[...]   # (B, T)
    m = jnp.max(logits, axis=1, keepdims=True)
    z = logits - m
    out_ref[...] = z - jnp.log(jnp.sum(jnp.exp(z), axis=1, keepdims=True))


# ------------------------- host-side packing (plain JAX / XLA) -------------------------
def pack_conv_weights(w1, w2, w3):
    """w{1,2,3}: (K, D, C). Pack into one (4*D, 3*C) matrix, zero-padding taps to K=4.
    In x padded with 3 zero rows each side: conv1 uses taps k'=2..3, conv2 k'=1..3,
    conv3 k'=0..3 (matches the torch padding=(K-1, 0) semantics)."""
    C = OUTPUT_CHANNEL
    w = jnp.zeros((KMAX, WORDS_DIM, FUSED_C), jnp.float32)
    w = w.at[2:4, :, 0:C].set(w1)            # conv1 (K=2)
    w = w.at[1:4, :, C:2 * C].set(w2)        # conv2 (K=3)
    w = w.at[0:4, :, 2 * C:3 * C].set(w3)    # conv3 (K=4)
    return w.reshape(FUSED_K, FUSED_C)


def pack_bias_mask(b1, b2, b3):
    """(B*L_PAD, 3C) additive operand: bias where the timestep is valid for that conv's
    output length (S+1 / S+2 / S+3), else -1e9 (ReLU -> 0, never wins the max)."""
    C = OUTPUT_CHANNEL
    t_idx = jnp.arange(L_PAD)[:, None]                                   # (L_PAD, 1)
    vlen = jnp.concatenate([jnp.full((C,), SEQ_LEN + 1, jnp.int32),
                            jnp.full((C,), SEQ_LEN + 2, jnp.int32),
                            jnp.full((C,), SEQ_LEN + 3, jnp.int32)])[None, :]
    bias = jnp.concatenate([b1, b2, b3], axis=1)                          # (1, 3C)
    bm = jnp.where(t_idx < vlen, bias, jnp.float32(-1e9))                 # (L_PAD, 3C)
    return jnp.tile(bm, (BATCH, 1))                                       # (B*L_PAD, 3C)


def build_im2col(x_emb_bsd):
    """(B, S, D) -> (B*L_PAD, 4*D) im2col slab (layout plumbing done in XLA)."""
    xp = jnp.pad(x_emb_bsd, ((0, 0), (PAD, PAD), (0, 0)))                 # (B, S+6, D)
    windows = [xp[:, k:k + L_MAX, :] for k in range(KMAX)]                # 4 x (B, L_MAX, D)
    cols = jnp.concatenate(windows, axis=-1)                              # (B, L_MAX, 4D)
    cols = jnp.pad(cols, ((0, 0), (0, L_PAD - L_MAX), (0, 0)))            # (B, L_PAD, 4D)
    return cols.reshape(BATCH * L_PAD, FUSED_K)


def relation_prediction_cnn(x_im2col, w_pack, bias_mask, wf, bf):
    T = wf.shape[1]
    vmem = pl.BlockSpec(memory_space=pltpu.MemorySpace.VMEM)
    return pl.pallas_call(
        rp_cnn_fused_kernel,
        out_shape=jax.ShapeDtypeStruct((BATCH, T), jnp.float32),
        in_specs=[vmem, vmem, vmem, vmem, vmem],
        out_specs=vmem,
    )(x_im2col, w_pack, bias_mask, wf, bf)


# ------------------------- pure-JAX reference -------------------------
def _reference(x_emb_bsd, w1, b1, w2, b2, w3, b3, wf, bf):
    B = x_emb_bsd.shape[0]
    xp = jnp.pad(x_emb_bsd, ((0, 0), (PAD, PAD), (0, 0)))

    def conv_pool(w, b, K, off, L):
        acc = jnp.zeros((B, L, OUTPUT_CHANNEL), jnp.float32)
        for k in range(K):
            acc = acc + jnp.einsum('bld,dc->blc', xp[:, off + k: off + k + L, :], w[k])
        acc = jnp.maximum(acc + b, 0.0)
        return jnp.max(acc, axis=1)

    p1 = conv_pool(w1, b1, 2, 2, SEQ_LEN + 1)
    p2 = conv_pool(w2, b2, 3, 1, SEQ_LEN + 2)
    p3 = conv_pool(w3, b3, 4, 0, SEQ_LEN + 3)
    feat = jnp.concatenate([p1, p2, p3], axis=1)
    logits = feat @ wf + bf
    return jax.nn.log_softmax(logits, axis=1)


if __name__ == "__main__":
    key = jax.random.PRNGKey(0)
    keys = jax.random.split(key, 10)

    # Deterministic synthetic parameters (shapes from __init__ of the CNN branch).
    embed_w = jax.random.normal(keys[0], (WORDS_NUM, WORDS_DIM), jnp.float32) * 0.1
    # conv weights stored as (K, D, C) — equivalent to torch (C, 1, K, D) transposed.
    w1 = jax.random.normal(keys[1], (2, WORDS_DIM, OUTPUT_CHANNEL), jnp.float32) * 0.1
    b1 = jax.random.normal(keys[2], (1, OUTPUT_CHANNEL), jnp.float32) * 0.1
    w2 = jax.random.normal(keys[3], (3, WORDS_DIM, OUTPUT_CHANNEL), jnp.float32) * 0.1
    b2 = jax.random.normal(keys[4], (1, OUTPUT_CHANNEL), jnp.float32) * 0.1
    w3 = jax.random.normal(keys[5], (4, WORDS_DIM, OUTPUT_CHANNEL), jnp.float32) * 0.1
    b3 = jax.random.normal(keys[6], (1, OUTPUT_CHANNEL), jnp.float32) * 0.1
    wf = jax.random.normal(keys[7], (3 * OUTPUT_CHANNEL, REL_LABEL), jnp.float32) * 0.1
    bf = jax.random.normal(keys[8], (1, REL_LABEL), jnp.float32) * 0.1

    # Input: time-major token ids (seq, batch), as in the torchtext-style module.
    text = jax.random.randint(keys[9], (SEQ_LEN, BATCH), 0, WORDS_NUM, jnp.int32)

    # Glue in plain JAX: embedding lookup + layout transpose + im2col + weight packing.
    x_emb = embed_w[text]                         # (S, B, D)
    x_emb_bsd = jnp.transpose(x_emb, (1, 0, 2))   # (B, S, D)
    x_im2col = build_im2col(x_emb_bsd)            # (B*L_PAD, 128)
    w_pack = pack_conv_weights(w1, w2, w3)        # (128, 48)
    bias_mask = pack_bias_mask(b1, b2, b3)        # (B*L_PAD, 48)

    scores = relation_prediction_cnn(x_im2col, w_pack, bias_mask, wf, bf)
    scores = jax.block_until_ready(scores)

    ref = _reference(x_emb_bsd, w1, b1, w2, b2, w3, b3, wf, bf)
    assert scores.shape == (BATCH, REL_LABEL)
    assert jnp.allclose(scores, ref, atol=1e-4), "mismatch vs JAX reference"

    print("KERNEL_OK")
</pallas_src>

<mosaic_0001>
module attributes {stable_mosaic.version = 11 : i64} {
  func.func @rp_cnn_fused_kernel(%arg0: memref<32x128xf32, #tpu.memory_space<vmem>>, %arg1: memref<128x48xf32, #tpu.memory_space<vmem>>, %arg2: memref<32x48xf32, #tpu.memory_space<vmem>>, %arg3: memref<48x8xf32, #tpu.memory_space<vmem>>, %arg4: memref<1x8xf32, #tpu.memory_space<vmem>>, %arg5: memref<2x8xf32, #tpu.memory_space<vmem>>) attributes {dimension_semantics = [], scalar_prefetch = 0 : i64, scratch_operands = 0 : i64, tpu.core_type = #tpu.core_type<tc>} {
    %c0 = arith.constant 0 : index
    %c0_0 = arith.constant 0 : index
    %0 = vector.load %arg0[%c0, %c0_0] : memref<32x128xf32, #tpu.memory_space<vmem>>, vector<32x128xf32>
    %c0_1 = arith.constant 0 : index
    %c0_2 = arith.constant 0 : index
    %1 = vector.load %arg1[%c0_1, %c0_2] : memref<128x48xf32, #tpu.memory_space<vmem>>, vector<128x48xf32>
    %cst = arith.constant dense<0.000000e+00> : vector<32x48xf32>
    %2 = tpu.matmul %0, %1, %cst {dimension_numbers = #tpu.dot_dimension_numbers<[1], [0], [0], [1], [0, 0, 1, 1], [], []>} : vector<32x128xf32>, vector<128x48xf32>, vector<32x48xf32> -> vector<32x48xf32>
    %c0_3 = arith.constant 0 : index
    %c0_4 = arith.constant 0 : index
    %3 = vector.load %arg2[%c0_3, %c0_4] : memref<32x48xf32, #tpu.memory_space<vmem>>, vector<32x48xf32>
    %4 = arith.addf %2, %3 : vector<32x48xf32>
    %cst_5 = arith.constant 0.000000e+00 : f32
    %5 = vector.broadcast %cst_5 : f32 to vector<32x48xf32>
    %6 = arith.maximumf %4, %5 : vector<32x48xf32>
    %7 = vector.extract_strided_slice %6 {offsets = [0, 0], sizes = [16, 48], strides = [1, 1]} : vector<32x48xf32> to vector<16x48xf32>
    %cst_6 = arith.constant dense<0xFF800000> : vector<48xf32>
    %8 = vector.multi_reduction <maximumf>, %7, %cst_6 [0] : vector<16x48xf32> to vector<48xf32>
    %9 = vector.shape_cast %8 : vector<48xf32> to vector<1x48xf32>
    %10 = vector.extract_strided_slice %6 {offsets = [16, 0], sizes = [16, 48], strides = [1, 1]} : vector<32x48xf32> to vector<16x48xf32>
    %cst_7 = arith.constant dense<0xFF800000> : vector<48xf32>
    %11 = vector.multi_reduction <maximumf>, %10, %cst_7 [0] : vector<16x48xf32> to vector<48xf32>
    %12 = vector.shape_cast %11 : vector<48xf32> to vector<1x48xf32>
    %13 = tpu.concatenate %9, %12 in 0 : vector<1x48xf32>, vector<1x48xf32> -> vector<2x48xf32>
    %c0_8 = arith.constant 0 : index
    %c0_9 = arith.constant 0 : index
    %14 = vector.load %arg3[%c0_8, %c0_9] : memref<48x8xf32, #tpu.memory_space<vmem>>, vector<48x8xf32>
    %cst_10 = arith.constant dense<0.000000e+00> : vector<2x8xf32>
    %15 = tpu.matmul %13, %14, %cst_10 {dimension_numbers = #tpu.dot_dimension_numbers<[1], [0], [0], [1], [0, 0, 1, 1], [], []>} : vector<2x48xf32>, vector<48x8xf32>, vector<2x8xf32> -> vector<2x8xf32>
    %c0_11 = arith.constant 0 : index
    %c0_12 = arith.constant 0 : index
    %16 = vector.load %arg4[%c0_11, %c0_12] : memref<1x8xf32, #tpu.memory_space<vmem>>, vector<1x8xf32>
    %17 = vector.broadcast %16 : vector<1x8xf32> to vector<2x8xf32>
    %18 = arith.addf %15, %17 : vector<2x8xf32>
    %cst_13 = arith.constant dense<0xFF800000> : vector<2xf32>
    %19 = vector.multi_reduction <maximumf>, %18, %cst_13 [1] : vector<2x8xf32> to vector<2xf32>
    %20 = vector.shape_cast %19 : vector<2xf32> to vector<2x1xf32>
    %21 = vector.broadcast %20 : vector<2x1xf32> to vector<2x8xf32>
    %22 = arith.subf %18, %21 : vector<2x8xf32>
    %23 = math.exp %22 : vector<2x8xf32>
    %cst_14 = arith.constant dense<0.000000e+00> : vector<2xf32>
    %24 = vector.multi_reduction <add>, %23, %cst_14 [1] : vector<2x8xf32> to vector<2xf32>
    %25 = vector.shape_cast %24 : vector<2xf32> to vector<2x1xf32>
    %26 = math.log %25 : vector<2x1xf32>
    %27 = vector.broadcast %26 : vector<2x1xf32> to vector<2x8xf32>
    %28 = arith.subf %22, %27 : vector<2x8xf32>
    %c0_15 = arith.constant 0 : index
    %c0_16 = arith.constant 0 : index
    %29 = vector.load %arg5[%c0_15, %c0_16] : memref<2x8xf32, #tpu.memory_space<vmem>>, vector<2x8xf32>
    tpu.vector_store %arg5[%c0_15, %c0_16], %28 {strides = array<i32>} : memref<2x8xf32, #tpu.memory_space<vmem>>, vector<2x8xf32>,
    return
  }
}

</mosaic_0001>

<bundles_post_ra>
// kernel: tpu_custom_call.1
= control target key start
LH: loop header
LB: loop body
LE: loop exit
PB: predicated region body
PF: predicated region fallthrough
CT: control target
= control target key end

     0   :  { %s517_s0 = inlined_call_operand.vmem [shape: f32[32,128], index: 0, kind: input, shape index: {}]   ;;  %s518_s1 = inlined_call_operand.vmem [shape: f32[128,48], index: 1, kind: input, shape index: {}]   ;;  %s519_s2 = inlined_call_operand.vmem [shape: f32[32,48], index: 2, kind: input, shape index: {}]   ;;  %s520_s3 = inlined_call_operand.vmem [shape: f32[48,8], index: 3, kind: input, shape index: {}]   ;;  %s521_s4 = inlined_call_operand.vmem [shape: f32[1,8], index: 4, kind: input, shape index: {}]   ;;  %s522_s5 = inlined_call_operand.hbm [shape: f32[2,8], index: 5, kind: output, shape index: {}]  }
   0x1   :  { %v40_v0 = vld [vmem:[%s518_s1 + $0x78] sm:$0xff]  ;;  %v39_v1 = vld [vmem:[%s518_s1 + $0x70] sm:$0xff]  ;;  %v38_v2 = vld [vmem:[%s518_s1 + $0x68] sm:$0xff] }
   0x2   :  { %298 = vmatprep.subr.mxu0 %v40_v0  ;;  %v37_v3 = vld [vmem:[%s518_s1 + $0x60] sm:$0xff]  ;;  %v36_v5 = vld [vmem:[%s518_s1 + $0x58] sm:$0xff] }
   0x3   :  { %299 = vmatpush3.msra.mxu0 %v40_v0  ;;  %v21_v4 = vld [vmem:[%s517_s0] sm:$0xff] }
   0x4   :  { %300 = vmatprep.subr.mxu0 %v39_v1  ;;  %330 = vmatprep.mubr.f32.mxu0 %v21_v4 }
   0x5   :  { %301 = vmatpush3.msra.mxu0 %v39_v1 }
   0x6   :  { %302 = vmatprep.subr.mxu0 %v38_v2 }
   0x7   :  { %303 = vmatpush3.msra.mxu0 %v38_v2 }
   0x8   :  { %304 = vmatprep.subr.mxu0 %v37_v3 }
   0x9   :  { %10 = vsyncpa [#allocation3], 0  ;;  %305 = vmatpush3.msra.mxu0 %v37_v3  ;;  %v35_v6 = vld [vmem:[%s518_s1 + $0x50] sm:$0xff]  ;;  %v34_v7 = vld [vmem:[%s518_s1 + $0x48] sm:$0xff]  ;;  %v380_v20 = vmov 0.0   ;;  %vm381_vm0 = vmmov 0  }
   0xa   :  { %306 = vmatprep.subr.mxu0 %v36_v5  ;;  %v33_v8 = vld [vmem:[%s518_s1 + $0x40] sm:$0xff]  ;;  %v32_v9 = vld [vmem:[%s518_s1 + $0x38] sm:$0xff]  ;;  %v31_v10 = vld [vmem:[%s518_s1 + $0x30] sm:$0xff]  ;;  %336 = vmatprep.subr.mxu1 %v380_v20  ;;  %vm134_vm1 = vcmask 392192   ;;  %vm153_vm2 = vcmask 1040384   ;;  %vm241_vm3 = vcmask 58368  }
   0xb   :  { %307 = vmatpush3.msra.mxu0 %v36_v5  ;;  %v30_v11 = vld [vmem:[%s518_s1 + $0x28] sm:$0xff]  ;;  %v29_v12 = vld [vmem:[%s518_s1 + $0x20] sm:$0xff]  ;;  %v28_v13 = vld [vmem:[%s518_s1 + $0x18] sm:$0xff]  ;;  %348 = vmatprep.mubr.msk.f32.mxu1 %vm381_vm0, %v380_v20  ;;  %s382_s26 = smov [#allocation2]  }
   0xc   :  { %308 = vmatprep.subr.mxu0 %v35_v6  ;;  %v27_v14 = vld [vmem:[%s518_s1 + $0x10] sm:$0xff]  ;;  %v26_v15 = vld [vmem:[%s518_s1 + $0x8] sm:$0xff]  ;;  %v25_v16 = vld [vmem:[%s518_s1] sm:$0xff] }
   0xd   :  { %309 = vmatpush3.msra.mxu0 %v35_v6  ;;  %v22_v17 = vld [vmem:[%s517_s0 + $0x8] sm:$0xff]  ;;  %v23_v18 = vld [vmem:[%s517_s0 + $0x10] sm:$0xff]  ;;  %v24_v19 = vld [vmem:[%s517_s0 + $0x18] sm:$0xff] }
   0xe   :  { %310 = vmatprep.subr.mxu0 %v34_v7  ;;  %v160_v21 = vld [vmem:[%s520_s3 + $0x28] sm:$0xff]  ;;  %v159_v22 = vld [vmem:[%s520_s3 + $0x20] sm:$0xff]  ;;  %v158_v23 = vld [vmem:[%s520_s3 + $0x18] sm:$0xff] }
   0xf   :  { %311 = vmatpush3.msra.mxu0 %v34_v7  ;;  %337 = vmatpush3.msra.mxu1 %v160_v21  ;;  %v157_v24 = vld [vmem:[%s520_s3 + $0x10] sm:$0xff]  ;;  %v156_v25 = vld [vmem:[%s520_s3 + $0x8] sm:$0xff]  ;;  %v155_v26 = vld [vmem:[%s520_s3] sm:$0xff] }
  0x10   :  { %312 = vmatprep.subr.mxu0 %v33_v8  ;;  %338 = vmatprep.subr.mxu1 %v380_v20  ;;  %v42_v27 = vld [vmem:[%s519_s2 + $0x8] sm:$0xff]  ;;  %v41_v29 = vld [vmem:[%s519_s2] sm:$0xff]  ;;  %v44_v32 = vld [vmem:[%s519_s2 + $0x18] sm:$0xff] }
  0x11   :  { %313 = vmatpush3.msra.mxu0 %v33_v8  ;;  %339 = vmatpush3.msra.mxu1 %v159_v22  ;;  %v43_v36 = vld [vmem:[%s519_s2 + $0x10] sm:$0xff]  ;;  %v269_v62 = vld [vmem:[%s521_s4] ss:$0 sm:$0xff]  ;;  %s261_s4 = sshll.u32 %s382_s26, 4  ;;  %s262_s4 = int_to_ptr.vmem [resolvable:$true] %s261_s4 }
  0x12   :  { %314 = vmatprep.subr.mxu0 %v32_v9  ;;  %340 = vmatprep.subr.mxu1 %v380_v20  ;;  %s358_s27 = scalar_lea.vmem %s262_s4, 32  ;;  %p363_p1 = scmp.lt.s32.totalorder %s262_s4, %s262_s4 }
  0x13   :  { %315 = vmatpush3.msra.mxu0 %v32_v9  ;;  %341 = vmatpush3.msra.mxu1 %v158_v23  ;;  %p359_p0 = scmp.ne.s32.totalorder %s262_s4, %s358_s27  ;;  %p364_p2 = scmp.lt.s32.totalorder %s358_s27, %s358_s27 }
  0x14   :  { %316 = vmatprep.subr.mxu0 %v31_v10  ;;  %342 = vmatprep.subr.mxu1 %v380_v20 }
  0x15   :  { %317 = vmatpush3.msra.mxu0 %v31_v10  ;;  %343 = vmatpush3.msra.mxu1 %v157_v24  ;;  %p365_p3 = por %p364_p2, %p363_p1 }
  0x16   :  { %318 = vmatprep.subr.mxu0 %v30_v11  ;;  %344 = vmatprep.subr.mxu1 %v380_v20 }
  0x17   :  { %319 = vmatpush3.msra.mxu0 %v30_v11  ;;  %345 = vmatpush3.msra.mxu1 %v156_v25  ;;  %p366_p4 = pnand %p365_p3, %p359_p0 }
  0x18   :  { %320 = vmatprep.subr.mxu0 %v29_v12  ;;  %346 = vmatprep.subr.mxu1 %v380_v20 }
  0x19   :  { %321 = vmatpush3.msra.mxu0 %v29_v12  ;;  %347 = vmatpush3.msra.mxu1 %v155_v26 }
  0x1a   :  { %322 = vmatprep.subr.mxu0 %v28_v13 }
  0x1b   :  { %323 = vmatpush3.msra.mxu0 %v28_v13 }
  0x1c   :  { %324 = vmatprep.subr.mxu0 %v27_v14 }
  0x1d   :  { %325 = vmatpush3.msra.mxu0 %v27_v14 }
  0x1e   :  { %326 = vmatprep.subr.mxu0 %v26_v15 }
  0x1f   :  { %327 = vmatpush3.msra.mxu0 %v26_v15 }
  0x20   :  { %328 = vmatprep.subr.mxu0 %v25_v16 }
  0x21   :  { %329 = vmatpush3.msra.mxu0 %v25_v16 }
  0x22   :  { %331 = vmatmul.mubr.f32.vlgmr.msra.gmra.mxu0 %v22_v17 }
  0x23   :  { %333 = vmatprep.mubr.f32.mxu0 %v23_v18 }
  0x26   :  { %334 = vmatmul.mubr.f32.gmra.mxu0 %v24_v19 }
  0xe2   :  { %v332_v28 = vpop.f32.mrf.mxu0 }
  0xe3   :  { %v117_v30 = vadd.f32 %v332_v28, %v42_v27 }
  0xe4   :  { %v111_v31 = vpop.f32.mrf.mxu0 }
  0xe5   :  { %v131_v33 = vmax.f32 %v117_v30, 0.0  ;;  %v112_v34 = vadd.f32 %v111_v31, %v41_v29 }
  0xe6   :  { %v335_v35 = vpop.f32.mrf.mxu0 }
  0xe7   :  { %v130_v37 = vmax.f32 %v112_v34, 0.0  ;;  %v127_v38 = vadd.f32 %v335_v35, %v44_v32  ;;  %v136_v40 = vsel %vm134_vm1, %v131_v33, -inf }
  0xe8   :  { %v121_v39 = vpop.f32.mrf.mxu0 }
  0xe9   :  { %v135_v41 = vsel %vm134_vm1, %v130_v37, -inf  ;;  %v133_v42 = vmax.f32 %v127_v38, 0.0  ;;  %v122_v43 = vadd.f32 %v121_v39, %v43_v36 }
  0xea   :  { %v137_v44 = vmax.f32 %v135_v41, %v136_v40 }
  0xeb   :  { %v132_v45 = vmax.f32 %v122_v43, 0.0  ;;  %v145_v47 = vsel %vm134_vm1, %v133_v42, -inf }
  0xec   :  { %v138_v46 = vrot.slane %v137_v44, 4 }
  0xed   :  { %v144_v48 = vsel %vm134_vm1, %v132_v45, -inf }
  0xee   :  { %v139_v49 = vmax.f32 %v137_v44, %v138_v46  ;;  %v146_v50 = vmax.f32 %v144_v48, %v145_v47 }
  0xf0   :  { %v140_v51 = vrot.slane %v139_v49, 2  ;;  %v147_v52 = vrot.slane %v146_v50, 4 }
  0xf2   :  { %v141_v53 = vmax.f32 %v139_v49, %v140_v51  ;;  %v148_v54 = vmax.f32 %v146_v50, %v147_v52 }
  0xf4   :  { %v149_v55 = vrot.slane %v148_v54, 2  ;;  %v142_v57 = vrot.slane %v141_v53, 1 }
  0xf6   :  { %v150_v56 = vmax.f32 %v148_v54, %v149_v55  ;;  %v143_v59 = vmax.f32 %v141_v53, %v142_v57 }
  0xf8   :  { %v151_v58 = vrot.slane %v150_v56, 1 }
  0xfa   :  { %v152_v60 = vmax.f32 %v150_v56, %v151_v58 }
  0xfc   :  { %v154_v61 = vsel %vm153_vm2, %v143_v59, %v152_v60 }
  0xfd   :  { %349 = vmatmul.mubr.msk.f32.vlgmr.msra.gmra.mxu1 %vm134_vm1, %v154_v61 }
 0x1bd   :  { %v237_v63 = vpop.f32.mrf.mxu1 }
 0x1be   :  { %v238_v0 = vadd.f32 %v269_v62, %v237_v63 }
 0x1bf   :  { %v350_v1 = vpop.f32.mrf.mxu1 }
 0x1c0   :  { %v242_v2 = vsel %vm241_vm3, %v238_v0, -inf }
 0x1c1   :  { %243 = vmax.xlane.f32.xlu0 %v242_v2 }
 0x24a   :  { %v244_v3 = vpop.xlane.xlu0 %243 }
 0x24b   :  { %v245_v4 = vsub.f32 %v238_v0, %v244_v3 }
 0x24d   :  { %v246_v5 = vmul.f32 1.442695, %v245_v4 }
 0x24f   :  { %354 = vpow2.f32 %v246_v5 }
 0x25c   :  { %v355_v6 = vpop.eup %354 }
 0x25d   :  { %v248_v7 = vsel %vm241_vm3, %v355_v6, 0.0 }
 0x25e   :  { %249 = vadd.xlane.f32.xlu0 %v248_v7 }
 0x2e7   :  { %v250_v8 = vpop.xlane.xlu0 %249 }
 0x2e8   :  { %356 = vlog2.f32 %v250_v8 }
 0x2f5   :  { %v357_v9 = vpop.eup %356 }
 0x2f6   :  { %v252_v10 = vmul.f32 0.6931472, %v357_v9 }
 0x2f8   :  { %v253_v11 = vsub.f32 %v245_v4, %v252_v10 }
 0x2fa   :  { %254 = vst.msk [vmem:[#allocation2] sm:$0x3] %vm241_vm3, %v253_v11 }
 0x2fb   :  { %369 = shalt.err (!%p366_p4)
}
 0x2fc   :  { %264 = dma.vmem_to_hbm [thread:$0]  %s262_s4, 32, %s522_s5, [#allocation3]  }
 0x2fd   :  { %378 = dma.done.wait [#allocation3], 32  }
 0x2fe   :  { %379 = vsyncadd [#allocation3], 4294967264 }
 0x2ff   :  { %268 = vsyncpa [#allocation3], 1 }

</bundles_post_ra>
